<compile_context>
chip_gen: v7x
topology: tpu7x:2x2x1
jax: 0.10.0
libtpu: 0.0.40
codegen_flags: <defaults>
</compile_context>

<pallas_src>
import jax
import jax.numpy as jnp
from jax import lax
from jax.experimental import pallas as pl
from jax.experimental.pallas import tpu as pltpu


def _round_up(x: int, m: int) -> int:
    return ((x + m - 1) // m) * m


# ~4 MiB of f32-equivalent elements per input block (per pipeline buffer).
# Budgeting in *elements* keeps the grid-step count identical for bf16 inputs
# (the f32 temporaries, not the stored input bytes, are the VMEM-limiting term).
_MAX_BLOCK_ELEMS = 1 << 20
_VMEM_LIMIT_BYTES = 48 * 1024 * 1024   # <= v7x 64 MiB physical; >> v5e 16 MiB default


def _make_kl_kernel(tr, sub, tiles_per_core, total_rows, mask_rows):
    """Accumulate per-core partial sums of
         s = var1/var2 + (mu1 - mu2)^2/var2 - log(var1)
    over row-tiles of a lane-dense (rows, C) view.  Constants are hoisted."""

    def kernel(pm_ref, ps_ref, mu2_ref, iv2_ref, out_ref):
        c = pl.program_id(0)          # core-parallel axis (v7x megacore)
        i = pl.program_id(1)          # sequential accumulation axis

        @pl.when(i == 0)
        def _init():
            out_ref[...] = jnp.zeros_like(out_ref)

        # Inputs stay in their storage dtype in HBM/VMEM; compute in f32 on the
        # VPU (v5e has no bf16 VALU path; f32 keeps the accumulation accurate).
        pm = pm_ref[...].astype(jnp.float32)      # (tr, C)
        ps = ps_ref[...].astype(jnp.float32)      # (tr, C)
        mu2 = mu2_ref[...]                         # (1, C) f32, broadcast over rows
        iv2 = iv2_ref[...]                         # (1, C) f32 = 1 / prior_var

        diff = pm - mu2
        # log(var1) computed as 2*log(std1): no underflow for tiny stds.
        s = (ps * ps + diff * diff) * iv2 - 2.0 * jnp.log(ps)

        if mask_rows:
            # Zero out rows past the real data (partial last tile / excess tile
            # of the core split).  Select, not multiply, so garbage NaN/Inf in
            # the unwritten part of an edge block cannot propagate.
            row0 = (c * tiles_per_core + i) * tr
            rows = lax.broadcasted_iota(jnp.int32, (tr, 1), 0) + row0
            s = jnp.where(rows < total_rows, s, 0.0)

        ncols = s.shape[1]
        if sub == 8:
            # Pure VPU vreg adds (sublane index preserved) -> no XLU in the hot loop.
            out_ref[...] += s.reshape(tr // 8, 8, ncols).sum(axis=0)
        else:
            # Only reached for a single tiny tile; one sublane reduce is fine.
            out_ref[...] += jnp.sum(s, axis=0, keepdims=True)

    return kernel


@jax.jit
def multivariate_normal_kl(post_mean, post_std, prior_mean, prior_inv_var,
                           prior_logvar_sum):
    """mean-over-batch KL( N(post_mean, post_std) || N(prior_mean, prior_var) ),
    summed over the event dim — same as Independent(Normal,1) + kl_divergence + mean."""
    B, D = post_mean.shape

    # ---- lane-dense layout without any HBM padding copies -------------------
    if D <= 128 and 128 % D == 0 and (B * D) % 128 == 0:
        # Packed view: flat element p maps to feature d = p % D, which depends
        # only on the lane (128 % D == 0), so one tiled prior row serves all rows.
        C = 128
        R = (B * D) // C
        pm2 = post_mean.reshape(R, C)              # zero-copy reshape
        ps2 = post_std.reshape(R, C)
        reps = C // D
        mu2 = jnp.tile(prior_mean.astype(jnp.float32), reps).reshape(1, C)
        iv2 = jnp.tile(prior_inv_var.astype(jnp.float32), reps).reshape(1, C)
    else:
        # TODO(synk): general lane-packing when B*D % 128 != 0 (needs a padded
        # flat copy or ragged DMA); fall back to the natural (B, D) layout.
        C = D
        R = B
        pm2, ps2 = post_mean, post_std
        mu2 = prior_mean.astype(jnp.float32).reshape(1, C)
        iv2 = prior_inv_var.astype(jnp.float32).reshape(1, C)

    # ---- balanced row tiling (big blocks, no row padding) -------------------
    c_pad = _round_up(C, 128)                      # VMEM lane footprint per row
    max_rows = max(8, ((_MAX_BLOCK_ELEMS // c_pad) // 8) * 8)
    if R <= max_rows:
        tr, num_tiles, num_cores = R, 1, 1
    else:
        n0 = pl.cdiv(R, max_rows)
        tr = _round_up(pl.cdiv(R, n0), 8)          # balanced, multiple of 8
        num_tiles = pl.cdiv(R, tr)
        num_cores = 2 if num_tiles >= 2 else 1     # v7x: one slice per TensorCore
    tiles_per_core = pl.cdiv(num_tiles, num_cores)
    sub = 8 if tr % 8 == 0 else 1
    mask_rows = num_cores * tiles_per_core * tr > R
    clamp_tiles = num_cores * tiles_per_core > num_tiles

    def in_index(c, i):
        t = c * tiles_per_core + i
        if clamp_tiles:                            # keep DMA in-bounds; the
            t = jnp.minimum(t, num_tiles - 1)      # excess tile is fully masked
        return (t, 0)

    kernel = _make_kl_kernel(tr, sub, tiles_per_core, R, mask_rows)

    partial = pl.pallas_call(
        kernel,
        out_shape=jax.ShapeDtypeStruct((num_cores * sub, C), jnp.float32),
        grid_spec=pltpu.PrefetchScalarGridSpec(
            num_scalar_prefetch=0,
            grid=(num_cores, tiles_per_core),
            in_specs=[
                pl.BlockSpec((tr, C), in_index),
                pl.BlockSpec((tr, C), in_index),
                pl.BlockSpec((1, C), lambda c, i: (0, 0)),   # prior mean (resident)
                pl.BlockSpec((1, C), lambda c, i: (0, 0)),   # prior 1/var (resident)
            ],
            out_specs=pl.BlockSpec((sub, C), lambda c, i: (c, 0)),  # per-core acc
        ),
        compiler_params=pltpu.CompilerParams(
            dimension_semantics=("parallel", "arbitrary"),
            vmem_limit_bytes=_VMEM_LIMIT_BYTES,
        ),
    )(pm2, ps2, mu2, iv2)

    # Single cross-lane/core reduce + hoisted constants in the (tiny) epilogue:
    # KL_mean = 0.5/B * [ S - B*D + B*sum(log var2) ]
    s_total = jnp.sum(partial)
    return 0.5 * (s_total / B - D + prior_logvar_sum)


class MultivariateNormalPallas:
    """Mirror of the PyTorch MultivariateNormal module: fixed diagonal-Gaussian prior
    over `shape` dims; __call__(post_mean, post_std) -> scalar mean-over-batch KL."""

    def __init__(self, mean: float, variance: float, shape: int):
        self.mean = jnp.ones((shape,), jnp.float32) * mean
        self.logvar = jnp.log(jnp.ones((shape,), jnp.float32) * variance)
        # Prior is fixed -> precompute once; keeps exp() off the per-tile path.
        self.inv_var = jnp.exp(-self.logvar)
        self.logvar_sum = jnp.sum(self.logvar)

    def __call__(self, post_mean, post_std):
        return multivariate_normal_kl(post_mean, post_std, self.mean,
                                      self.inv_var, self.logvar_sum)


if __name__ == "__main__":
    key = jax.random.PRNGKey(0)
    B, D = 8, 32                     # batch=8, latent dim (shape)=32
    k1, k2 = jax.random.split(key)
    post_mean = jax.random.normal(k1, (B, D), dtype=jnp.float32)
    post_std = jax.nn.softplus(jax.random.normal(k2, (B, D), dtype=jnp.float32)) + 1e-3

    module = MultivariateNormalPallas(mean=0.0, variance=1.0, shape=D)
    kl = module(post_mean, post_std)
    jax.block_until_ready(kl)

    # pure-JAX reference (same math as torch.distributions.kl_divergence)
    prior_std = jnp.exp(0.5 * module.logvar)
    var_ratio = (post_std / prior_std) ** 2
    t1 = ((post_mean - module.mean) / prior_std) ** 2
    kl_ref = jnp.mean(jnp.sum(0.5 * (var_ratio + t1 - 1.0 - jnp.log(var_ratio)), axis=-1))
    assert jnp.allclose(kl, kl_ref, rtol=1e-5, atol=1e-4), (kl, kl_ref)

    print("KERNEL_OK")
</pallas_src>

<mosaic_0001>
module attributes {stable_mosaic.version = 11 : i64} {
  func.func @kernel(%arg0: i32, %arg1: i32, %arg2: memref<2x128xf32, #tpu.memory_space<vmem>>, %arg3: memref<2x128xf32, #tpu.memory_space<vmem>>, %arg4: memref<1x128xf32, #tpu.memory_space<vmem>>, %arg5: memref<1x128xf32, #tpu.memory_space<vmem>>, %arg6: memref<1x128xf32, #tpu.memory_space<vmem>>) attributes {dimension_semantics = [#tpu.dimension_semantics<parallel>, #tpu.dimension_semantics<arbitrary>], iteration_bounds = array<i64: 1, 1>, scalar_prefetch = 0 : i64, scratch_operands = 0 : i64, tpu.core_type = #tpu.core_type<tc>, window_params = [{transform_indices = @transform_0, window_bounds = array<i64: 2, 128>}, {transform_indices = @transform_1, window_bounds = array<i64: 2, 128>}, {pipeline_mode = #tpu.pipeline_mode<synchronous>, transform_indices = @transform_2, window_bounds = array<i64: 1, 128>}, {pipeline_mode = #tpu.pipeline_mode<synchronous>, transform_indices = @transform_3, window_bounds = array<i64: 1, 128>}, {transform_indices = @transform_4, window_bounds = array<i64: 1, 128>}]} {
    %c0_i32 = arith.constant 0 : i32
    %0 = arith.cmpi eq, %arg1, %c0_i32 : i32
    %1 = arith.extui %0 : i1 to i32
    %c0_i32_0 = arith.constant 0 : i32
    %2 = arith.cmpi ne, %1, %c0_i32_0 : i32
    scf.if %2 {
      %cst_13 = arith.constant 0.000000e+00 : f32
      %23 = vector.broadcast %cst_13 : f32 to vector<1x128xf32>
      %c0_14 = arith.constant 0 : index
      %c0_15 = arith.constant 0 : index
      %24 = vector.load %arg6[%c0_14, %c0_15] : memref<1x128xf32, #tpu.memory_space<vmem>>, vector<1x128xf32>
      tpu.vector_store %arg6[%c0_14, %c0_15], %23 {strides = array<i32>} : memref<1x128xf32, #tpu.memory_space<vmem>>, vector<1x128xf32>,
    } else {
    }
    %c0 = arith.constant 0 : index
    %c0_1 = arith.constant 0 : index
    %3 = vector.load %arg2[%c0, %c0_1] : memref<2x128xf32, #tpu.memory_space<vmem>>, vector<2x128xf32>
    %c0_2 = arith.constant 0 : index
    %c0_3 = arith.constant 0 : index
    %4 = vector.load %arg3[%c0_2, %c0_3] : memref<2x128xf32, #tpu.memory_space<vmem>>, vector<2x128xf32>
    %c0_4 = arith.constant 0 : index
    %c0_5 = arith.constant 0 : index
    %5 = vector.load %arg4[%c0_4, %c0_5] : memref<1x128xf32, #tpu.memory_space<vmem>>, vector<1x128xf32>
    %c0_6 = arith.constant 0 : index
    %c0_7 = arith.constant 0 : index
    %6 = vector.load %arg5[%c0_6, %c0_7] : memref<1x128xf32, #tpu.memory_space<vmem>>, vector<1x128xf32>
    %7 = vector.broadcast %5 : vector<1x128xf32> to vector<2x128xf32>
    %8 = arith.subf %3, %7 : vector<2x128xf32>
    %9 = arith.mulf %4, %4 : vector<2x128xf32>
    %10 = arith.mulf %8, %8 : vector<2x128xf32>
    %11 = arith.addf %9, %10 : vector<2x128xf32>
    %12 = vector.broadcast %6 : vector<1x128xf32> to vector<2x128xf32>
    %13 = arith.mulf %11, %12 : vector<2x128xf32>
    %14 = math.log %4 : vector<2x128xf32>
    %cst = arith.constant 2.000000e+00 : f32
    %15 = vector.broadcast %cst : f32 to vector<2x128xf32>
    %16 = arith.mulf %15, %14 : vector<2x128xf32>
    %17 = arith.subf %13, %16 : vector<2x128xf32>
    %c0_8 = arith.constant 0 : index
    %c0_9 = arith.constant 0 : index
    %18 = vector.load %arg6[%c0_8, %c0_9] : memref<1x128xf32, #tpu.memory_space<vmem>>, vector<1x128xf32>
    %cst_10 = arith.constant dense<0.000000e+00> : vector<128xf32>
    %19 = vector.multi_reduction <add>, %17, %cst_10 [0] : vector<2x128xf32> to vector<128xf32>
    %20 = vector.shape_cast %19 : vector<128xf32> to vector<1x128xf32>
    %21 = arith.addf %18, %20 : vector<1x128xf32>
    %c0_11 = arith.constant 0 : index
    %c0_12 = arith.constant 0 : index
    %22 = vector.load %arg6[%c0_11, %c0_12] : memref<1x128xf32, #tpu.memory_space<vmem>>, vector<1x128xf32>
    tpu.vector_store %arg6[%c0_11, %c0_12], %21 {strides = array<i32>} : memref<1x128xf32, #tpu.memory_space<vmem>>, vector<1x128xf32>,
    return
  }
  func.func @transform_0(%arg0: i32, %arg1: i32) -> (i32, i32) {
    %c1_i32 = arith.constant 1 : i32
    %0 = arith.muli %arg0, %c1_i32 : i32
    %1 = arith.addi %0, %arg1 : i32
    %c0_i32 = arith.constant 0 : i32
    %c0_i32_0 = arith.constant 0 : i32
    return %1, %c0_i32 : i32, i32
  }
  func.func @transform_1(%arg0: i32, %arg1: i32) -> (i32, i32) {
    %c1_i32 = arith.constant 1 : i32
    %0 = arith.muli %arg0, %c1_i32 : i32
    %1 = arith.addi %0, %arg1 : i32
    %c0_i32 = arith.constant 0 : i32
    %c0_i32_0 = arith.constant 0 : i32
    return %1, %c0_i32 : i32, i32
  }
  func.func @transform_2(%arg0: i32, %arg1: i32) -> (i32, i32) {
    %c0_i32 = arith.constant 0 : i32
    %c0_i32_0 = arith.constant 0 : i32
    %c0_i32_1 = arith.constant 0 : i32
    return %c0_i32, %c0_i32_0 : i32, i32
  }
  func.func @transform_3(%arg0: i32, %arg1: i32) -> (i32, i32) {
    %c0_i32 = arith.constant 0 : i32
    %c0_i32_0 = arith.constant 0 : i32
    %c0_i32_1 = arith.constant 0 : i32
    return %c0_i32, %c0_i32_0 : i32, i32
  }
  func.func @transform_4(%arg0: i32, %arg1: i32) -> (i32, i32) {
    %c0_i32 = arith.constant 0 : i32
    %c0_i32_0 = arith.constant 0 : i32
    return %arg0, %c0_i32 : i32, i32
  }
}

</mosaic_0001>

<bundles_post_ra>
// kernel: tile.14
= control target key start
LH: loop header
LB: loop body
LE: loop exit
PB: predicated region body
PF: predicated region fallthrough
CT: control target
= control target key end

     0   :  { %vm7_vm0 = vcmask 261120   ;;  %s37_s8 = smov 32   ;;  %s38_s9 = smov 64   ;;  %vm13_vm1 = vcmask 1048320   ;;  %vm19_vm2 = vcmask 785920   ;;  %vm25_vm3 = vcmask 523520   ;;  %s55_s0 = inlined_call_operand.vmem [shape: f32[4,32], index: 0, kind: input, shape index: {}]   ;;  %s56_s1 = inlined_call_operand.vmem [shape: f32[1,128], index: 1, kind: output, shape index: {}]  }
   0x1   :  { %v4_v0 = vld [vmem:[%s55_s0] sm:$0xf]  ;;  %s36_s0 = smov 96  }
   0x2   :  { %5 = vst [vmem:[#allocation1] sm:$0xf] %v4_v0 }
   0x9   :  { %v10_v1 = vld [vmem:[#allocation1 + $0x3] sm:$0x1]   ;;  %v22_v2 = vld [vmem:[#allocation1 + $0x1] sm:$0x1]   ;;  %v6_v3 = vld [vmem:[#allocation1] sm:$0x1]  }
   0xa   :  { %11 = vrot.lane.b32.xlu0 %v10_v1, %s36_s0  ;;  %23 = vrot.lane.b32.xlu1 %v22_v2, %s37_s8  ;;  %v16_v4 = vld [vmem:[#allocation1 + $0x2] sm:$0x1]   ;;  %8 = vst.msk [vmem:[#allocation0] sm:$0x1] %vm7_vm0, %v6_v3  }
   0xe   :  { %17 = vrot.lane.b32.xlu0 %v16_v4, %s38_s9 }
  0x7c   :  { %v12_v5 = vpop.permute.xlu0 %11   ;;  %v24_v6 = vpop.permute.xlu1 %23  }
  0x7d   :  { %14 = vst.msk [vmem:[#allocation0] sm:$0x1] %vm13_vm1, %v12_v5  }
  0x80   :  { %v18_v7 = vpop.permute.xlu0 %17  }
  0x81   :  { %20 = vst.msk [vmem:[#allocation0] sm:$0x1] %vm19_vm2, %v18_v7  }
  0x82   :  { %26 = vst.msk [vmem:[#allocation0] sm:$0x1] %vm25_vm3, %v24_v6  }
  0x89   :  { %v30_v8 = vld [vmem:[#allocation0] sm:$0x1] }
  0x8a   :  { %32 = vst [vmem:[%s56_s1] sm:$0x1] %v30_v8 }

// kernel: tile.13
= control target key start
LH: loop header
LB: loop body
LE: loop exit
PB: predicated region body
PF: predicated region fallthrough
CT: control target
= control target key end

     0   :  { %s22_s0 = inlined_call_operand.vmem [shape: f32[32], index: 0, kind: input, shape index: {}]   ;;  %s23_s1 = inlined_call_operand.vmem [shape: f32[4,32], index: 1, kind: output, shape index: {}]  }
   0x1   :  { %v4_v0 = vld [vmem:[%s22_s0] ss:$0 sm:$0xff] }
   0x2   :  { %5 = vst [vmem:[%s23_s1] sm:$0xf] %v4_v0 }

// kernel: multivariate_normal_kl.1
= control target key start
LH: loop header
LB: loop body
LE: loop exit
PB: predicated region body
PF: predicated region fallthrough
CT: control target
= control target key end

     0   :  { %v113_v0 = vmov 0.0   ;;  %vm82_vm0 = vcmask 1041408   ;;  %s160_s4 = inlined_call_operand.vmem [shape: f32[1,128], index: 4, kind: output, shape index: {}]   ;;  %s161_s0 = inlined_call_operand.vmem [shape: f32[2,128], index: 0, kind: input, shape index: {}]   ;;  %s162_s1 = inlined_call_operand.vmem [shape: f32[2,128], index: 1, kind: input, shape index: {}]   ;;  %s163_s2 = inlined_call_operand.vmem [shape: f32[1,128], index: 2, kind: input, shape index: {}]   ;;  %s164_s3 = inlined_call_operand.vmem [shape: f32[1,128], index: 3, kind: input, shape index: {}]  }
   0x1   :  { %55 = vst [vmem:[%s160_s4] sm:$0x1] %v113_v0  ;;  %v56_v1 = vld [vmem:[%s161_s0] sm:$0x3] }
   0x2   :  { %v57_v2 = vld [vmem:[%s162_s1] sm:$0x3] }
   0x3   :  { %v108_v3 = vld [vmem:[%s163_s2] ss:$0 sm:$0xff]  ;;  %111 = vlog2.f32 %v57_v2  ;;  %v67_v5 = vmul.f32 %v57_v2, %v57_v2 }
   0x4   :  { %v66_v4 = vsub.f32 %v56_v1, %v108_v3  ;;  %v109_v8 = vld [vmem:[%s164_s3] ss:$0 sm:$0xff] }
   0x6   :  { %v68_v6 = vmul.f32 %v66_v4, %v66_v4 }
   0x8   :  { %v69_v7 = vadd.f32 %v68_v6, %v67_v5  ;;  %v81_v20 = vld [vmem:[%s160_s4] sm:$0x1] }
   0xa   :  { %v76_v10 = vmul.f32 %v109_v8, %v69_v7 }
   0xd   :  { %v112_v9 = vpop.eup %111 }
   0xe   :  { %v78_v11 = vmul.f32 0.6931472, %v112_v9 }
  0x10   :  { %v79_v12 = vmul.f32 2.0, %v78_v11 }
  0x12   :  { %v80_v13 = vsub.f32 %v76_v10, %v79_v12 }
  0x14   :  { %v83_v14 = vsel %vm82_vm0, %v80_v13, 0.0 }
  0x15   :  { %v84_v15 = vrot.slane %v83_v14, 4 }
  0x17   :  { %v85_v16 = vadd.f32 %v84_v15, %v83_v14 }
  0x19   :  { %v86_v17 = vrot.slane %v85_v16, 2 }
  0x1b   :  { %v87_v18 = vadd.f32 %v86_v17, %v85_v16 }
  0x1d   :  { %v88_v19 = vrot.slane %v87_v18, 1 }
  0x1f   :  { %v89_v21 = vadd.f32 %v88_v19, %v87_v18 }
  0x21   :  { %v90_v22 = vadd.f32 %v89_v21, %v81_v20 }
  0x23   :  { %91 = vst [vmem:[%s160_s4] sm:$0x1] %v90_v22 }

</bundles_post_ra>
